<compile_context>
chip_gen: v7x
topology: tpu7x:2x2x1
jax: 0.10.0
libtpu: 0.0.40
codegen_flags: <defaults>
</compile_context>

<pallas_src>
import functools

import jax
import jax.numpy as jnp
from jax.experimental import pallas as pl
from jax.experimental.pallas import tpu as pltpu


def ngl_kernel(x_ref, t_ref, out_ref, *, total_rows, block_rows):
    """One batch tile: stable softmax + NGL loss term, emits a partial sum."""
    x = x_ref[...].astype(jnp.float32)            # (TB, C), cast from native dtype
    t = t_ref[...]                                # (TB, 1) int32 class indices
    tb, c = x.shape

    # Numerically-stable softmax over the class (lane) axis.
    m = jnp.max(x, axis=-1, keepdims=True)
    e = jnp.exp(x - m)
    denom = jnp.sum(e, axis=-1, keepdims=True)
    # Exact reciprocal keeps us within ~1e-6 of the reference; flip to
    # approx=True (single EUP vrcp, free slot) if the accuracy budget allows.
    s = e * pl.reciprocal(denom, approx=False)

    # one_hot(target, num_classes=C) built in-register (no gather).
    col = jax.lax.broadcasted_iota(jnp.int32, (tb, c), 1)
    onehot = (col == t).astype(jnp.float32)

    # exp(2.4092 - s - s*t) - cos(cos(sin(s)))
    val = jnp.exp(2.4092 - s - s * onehot) - jnp.cos(jnp.cos(jnp.sin(s)))

    # Mask rows past the true batch size -- only emitted for ragged last tiles.
    if total_rows % block_rows != 0:
        row = jax.lax.broadcasted_iota(jnp.int32, (tb, 1), 0) + pl.program_id(0) * tb
        val = jnp.where(row < total_rows, val, 0.0)

    # Per-block partial sum, broadcast over an (8,128) tile -> unmasked,
    # lane-dense store.  Wrapper reduces across blocks and normalizes once.
    out_ref[...] = jnp.broadcast_to(jnp.sum(val), out_ref.shape)


def _pick_tile_rows(batch, num_classes, itemsize,
                    vmem_budget_bytes=8 * 1024 * 1024, max_rows=1024):
    """Rows per tile: double-buffered input tile stays under the VMEM budget,
    multiple of 8 (sublane), capped to amortize the ~0.35us/step overhead."""
    tb = vmem_budget_bytes // (2 * num_classes * itemsize)
    tb = max(8, min(tb, max_rows))
    tb = (tb // 8) * 8
    padded_b = pl.cdiv(batch, 8) * 8
    return max(8, min(tb, padded_b))


def ngl_loss(x, target, block_rows=None):
    B, C = x.shape
    t2d = target.astype(jnp.int32).reshape(B, 1)

    if block_rows is None:
        block_rows = _pick_tile_rows(B, C, jnp.dtype(x.dtype).itemsize)
    tb = block_rows
    num_blocks = pl.cdiv(B, tb)

    partials = pl.pallas_call(
        functools.partial(ngl_kernel, total_rows=B, block_rows=tb),
        out_shape=jax.ShapeDtypeStruct((num_blocks, 8, 128), jnp.float32),
        grid=(num_blocks,),
        in_specs=[
            pl.BlockSpec((tb, C), lambda i: (i, 0)),   # x streamed in native dtype
            pl.BlockSpec((tb, 1), lambda i: (i, 0)),   # per-row class index
        ],
        out_specs=pl.BlockSpec((1, 8, 128), lambda i: (i, 0, 0)),
        compiler_params=pltpu.CompilerParams(
            dimension_semantics=("parallel",),          # megacore sharding on v7x
        ),
    )(x, t2d)

    # One element per block carries the partial; normalize once here.
    return jnp.sum(partials[:, 0, 0]) * (1.0 / (B * C))


def ngl_loss_ref(x, target):
    # Pure-JAX reference of the PyTorch forward.
    C = x.shape[1]
    onehot = jax.nn.one_hot(target, C, dtype=jnp.float32)
    s = jax.nn.softmax(x.astype(jnp.float32), axis=-1)
    val = jnp.exp(2.4092 - s - s * onehot) - jnp.cos(jnp.cos(jnp.sin(s)))
    return jnp.mean(val)


if __name__ == "__main__":
    key = jax.random.PRNGKey(0)
    kx, kt = jax.random.split(key)
    B, C = 64, 128
    x = jax.random.normal(kx, (B, C), dtype=jnp.float32)
    target = jax.random.randint(kt, (B,), 0, C, dtype=jnp.int32)

    # block_rows=16 -> 4 grid steps, exercising tiling + partial-sum reduction.
    loss = ngl_loss(x, target, block_rows=16)
    jax.block_until_ready(loss)

    ref = ngl_loss_ref(x, target)
    assert jnp.allclose(loss, ref, atol=1e-5, rtol=1e-5), (loss, ref)
    print("KERNEL_OK")
</pallas_src>

<mosaic_0001>
module attributes {stable_mosaic.version = 11 : i64} {
  func.func @ngl_kernel(%arg0: i32, %arg1: memref<16x128xf32, #tpu.memory_space<vmem>>, %arg2: memref<16x1xi32, #tpu.memory_space<vmem>>, %arg3: memref<1x8x128xf32, #tpu.memory_space<vmem>>) attributes {dimension_semantics = [#tpu.dimension_semantics<parallel>], iteration_bounds = array<i64: 4>, scalar_prefetch = 0 : i64, scratch_operands = 0 : i64, tpu.core_type = #tpu.core_type<tc>, window_params = [{transform_indices = @transform_0, window_bounds = array<i64: 16, 128>}, {transform_indices = @transform_1, window_bounds = array<i64: 16, 1>}, {transform_indices = @transform_2, window_bounds = array<i64: 1, 8, 128>}]} {
    %c0 = arith.constant 0 : index
    %c0_0 = arith.constant 0 : index
    %0 = vector.load %arg1[%c0, %c0_0] : memref<16x128xf32, #tpu.memory_space<vmem>>, vector<16x128xf32>
    %c0_1 = arith.constant 0 : index
    %c0_2 = arith.constant 0 : index
    %1 = vector.load %arg2[%c0_1, %c0_2] : memref<16x1xi32, #tpu.memory_space<vmem>>, vector<16x1xi32>
    %cst = arith.constant dense<0xFF800000> : vector<16xf32>
    %2 = vector.multi_reduction <maximumf>, %0, %cst [1] : vector<16x128xf32> to vector<16xf32>
    %3 = vector.shape_cast %2 : vector<16xf32> to vector<16x1xf32>
    %4 = vector.broadcast %3 : vector<16x1xf32> to vector<16x128xf32>
    %5 = arith.subf %0, %4 : vector<16x128xf32>
    %6 = math.exp %5 : vector<16x128xf32>
    %cst_3 = arith.constant dense<0.000000e+00> : vector<16xf32>
    %7 = vector.multi_reduction <add>, %6, %cst_3 [1] : vector<16x128xf32> to vector<16xf32>
    %8 = vector.shape_cast %7 : vector<16xf32> to vector<16x1xf32>
    %9 = tpu.reciprocal %8 : vector<16x1xf32> -> vector<16x1xf32>
    %10 = vector.broadcast %9 : vector<16x1xf32> to vector<16x128xf32>
    %11 = arith.mulf %6, %10 : vector<16x128xf32>
    %12 = tpu.iota {dimensions = array<i32: 1>} : vector<16x128xi32>
    %13 = vector.broadcast %1 : vector<16x1xi32> to vector<16x128xi32>
    %14 = arith.cmpi eq, %12, %13 : vector<16x128xi32>
    %15 = arith.extui %14 : vector<16x128xi1> to vector<16x128xi32>
    %16 = arith.sitofp %15 : vector<16x128xi32> to vector<16x128xf32>
    %cst_4 = arith.constant 2.409200e+00 : f32
    %17 = vector.broadcast %cst_4 : f32 to vector<16x128xf32>
    %18 = arith.subf %17, %11 : vector<16x128xf32>
    %19 = arith.mulf %11, %16 : vector<16x128xf32>
    %20 = arith.subf %18, %19 : vector<16x128xf32>
    %21 = math.exp %20 : vector<16x128xf32>
    %22 = math.sin %11 : vector<16x128xf32>
    %23 = math.cos %22 : vector<16x128xf32>
    %24 = math.cos %23 : vector<16x128xf32>
    %25 = arith.subf %21, %24 : vector<16x128xf32>
    %26 = vector.shape_cast %25 : vector<16x128xf32> to vector<1x16x128xf32>
    %cst_5 = arith.constant dense<0.000000e+00> : vector<1xf32>
    %27 = vector.multi_reduction <add>, %26, %cst_5 [1, 2] : vector<1x16x128xf32> to vector<1xf32>
    %28 = vector.shape_cast %27 : vector<1xf32> to vector<1x1x1xf32>
    %29 = vector.extract %28[0, 0, 0] : f32 from vector<1x1x1xf32>
    %30 = vector.broadcast %29 : f32 to vector<1x8x128xf32>
    %c0_6 = arith.constant 0 : index
    %c0_7 = arith.constant 0 : index
    %c0_8 = arith.constant 0 : index
    %31 = vector.load %arg3[%c0_6, %c0_7, %c0_8] : memref<1x8x128xf32, #tpu.memory_space<vmem>>, vector<1x8x128xf32>
    tpu.vector_store %arg3[%c0_6, %c0_7, %c0_8], %30 {strides = array<i32>} : memref<1x8x128xf32, #tpu.memory_space<vmem>>, vector<1x8x128xf32>,
    return
  }
  func.func @transform_0(%arg0: i32) -> (i32, i32) {
    %c0_i32 = arith.constant 0 : i32
    %c0_i32_0 = arith.constant 0 : i32
    return %arg0, %c0_i32 : i32, i32
  }
  func.func @transform_1(%arg0: i32) -> (i32, i32) {
    %c0_i32 = arith.constant 0 : i32
    %c0_i32_0 = arith.constant 0 : i32
    return %arg0, %c0_i32 : i32, i32
  }
  func.func @transform_2(%arg0: i32) -> (i32, i32, i32) {
    %c0_i32 = arith.constant 0 : i32
    %c0_i32_0 = arith.constant 0 : i32
    %c0_i32_1 = arith.constant 0 : i32
    return %arg0, %c0_i32, %c0_i32_0 : i32, i32, i32
  }
}

</mosaic_0001>

<bundles_post_ra>
// kernel: tpu_custom_call.1
= control target key start
LH: loop header
LB: loop body
LE: loop exit
PB: predicated region body
PF: predicated region fallthrough
CT: control target
= control target key end

     0   :  { %7 = vsyncpa [#allocation3], 0  ;;  %s1548_s0 = inlined_call_operand.vmem [shape: f32[64,128], index: 0, kind: input, shape index: {}]   ;;  %s1549_s1 = inlined_call_operand.vmem [shape: s32[64,1], index: 1, kind: input, shape index: {}]   ;;  %s1550_s2 = inlined_call_operand.hbm [shape: f32[4,8,128], index: 2, kind: output, shape index: {}]  }
   0x1   :  { %9 = vsyncpa [#allocation3 + $0x1], 0  ;;  %s1169_s9 = smov 0   ;;  %s1171_s10 = smov 0  }
   0x2   :  { %s1173_s11 = smov 0   ;;  %s1175_s12 = smov 0  }
   0x3 LB: > { %s1190_s13 = sadd.s32 4294967295, %s1143_s12   ;;  %s931_s14 = sadd.s32 4294967294, %s1143_s12   ;;  %s1143_s12 = sphi %s1175_s12, %s1560_s12   ;;  %s1139_s11 = sphi %s1173_s11, %s1559_s11   ;;  %s1135_s10 = sphi %s1171_s10, %s1558_s10   ;;  %s1131_s9 = sphi %s1169_s9, %s1557_s9  }
   0x4   : > { %s1194_s15 = sadd.s32 1, %s1143_s12   ;;  %s74_s16 = sadd.s32 1, %s1139_s11 }
   0x5   : > { %s71_s17 = ssub.s32 %s1143_s12, %s1194_s15  ;;  %p84_p0 = scmp.ne.s32.totalorder %s1139_s11, %s1135_s10 }
   0x6   : > { %p72_p1 = scmp.eq.s32.totalorder %s71_s17, 0  ;;  %p85_p2 = scmp.eq.s32.totalorder %s1190_s13, 3 }
   0x7   : > { %p90_p3 = scmp.ne.s32.totalorder %s1135_s10, %s1131_s9  ;;  %p91_p4 = scmp.eq.s32.totalorder %s931_s14, 3 }
   0x8   : > { %s1205_s18 = scalar_select %p72_p1, %s1139_s11, %s74_s16  }
   0x9   : > { %p1207_p5 = por %p85_p2, %p84_p0  ;;  %p1211_p6 = por %p91_p4, %p90_p3 }
   0xa   : > { %p934_p7 = scmp.ge.s32.totalorder %s1143_s12, 1  ;;  %p127_p8 = scmp.lt.s32.totalorder %s1143_s12, 5 }
   0xc   : > { %p128_p9 = pnand %p934_p7, %p127_p8 }
   0xd   : > { %s936_s21 = sshll.u32 (!%p128_p9), %s1190_s13, 1  ;;  %v1145_v2 = vmov (!%p128_p9), 0   ;;  %v1146_v40 = vmov (!%p128_p9), 683565275   ;;  %v1147_v42 = vmov (!%p128_p9), 2475754826  }
   0xe   : > { %131 = sbr.rel (%p128_p9) target bundleno = 821 (0x335), region = 28  ;;  %p155_p10 = scmp.lt.s32.totalorder (!%p128_p9), %s936_s21, 7  ;;  %1043 = vset.pattern.permute.xlu0 (!%p128_p9), %v1145_v2  ;;  %1044 = vset.pattern.permute.xlu1 (!%p128_p9), %v1145_v2  ;;  %v1148_v44 = vmov (!%p128_p9), 2131351028   ;;  %v1149_v48 = vmov (!%p128_p9), 2102212464  }
   0xf   : > { %v1150_v50 = vmov (!%p128_p9), 920167782   ;;  %v1151_v55 = vmov (!%p128_p9), 1326507024   ;;  %s151_s29 = sand.u32 (!%p128_p9), 1, %s1135_s10   ;;  %s967_s5 = sshll.u32 (!%p128_p9), %s1190_s13, 7 }
  0x10   : > { %s935_s30 = sshll.u32 (!%p128_p9), %s151_s29, 3  ;;  %s1508_s14 = scalar_lea.hbm (!%p128_p9), %s1550_s2, %s967_s5 }
  0x11   : > { %s153_s3 = scalar_lea.vmem (!%p128_p9), [#allocation2], %s935_s30  ;;  %s847_s16 = scalar_lea.sflag (!%p128_p9), [#allocation3], %s151_s29 }
  0x12   : > { %s860_s4 = sshll.u32 (!%p128_p9), %s153_s3, 4  ;;  %s1153_s13 = smov (!%p128_p9), [#allocation2]   ;;  %s1503_s4 = int_to_ptr.vmem [resolvable:$true] %s860_s4 }
  0x13   : > { %s1081_s17 = scalar_lea.vmem (!%p128_p9), %s1503_s4, 128 }
  0x14   : > { %p1082_p11 = scmp.ne.s32.totalorder (!%p128_p9), %s1503_s4, %s1081_s17 }
  0x15   : > { %s1562_s21 = smov (!%p155_p10, %s936_s21), 7 }
  0x16   : > { %s937_s22 = sshll.u32 %s1562_s21, 3  ;;  %p1083_p12 = pnand %p1082_p11, %p1207_p5 }
  0x17   : > { %s158_s25 = scalar_lea.vmem %s1548_s0, %s937_s22  ;;  %s164_s28 = scalar_lea.vmem %s1549_s1, %s937_s22 }
  0x18   : > { %v166_v0 = vld [vmem:[%s158_s25] sm:$0xff]  ;;  %v167_v1 = vld [vmem:[%s158_s25 + $0x8] sm:$0xff]  ;;  %p1084_p13 = pneg %p1083_p12  ;;  %s1085_s21 = sshll.u32 %s1153_s13, 4  ;;  %s1086_s21 = int_to_ptr.vmem [resolvable:$false] %s1085_s21 }
  0x19   : > { %170 = vmax.xlane.f32.xlu0 %v166_v0  ;;  %v168_v3 = vld [vmem:[%s164_s28] sm:$0xff]  ;;  %v169_v12 = vld [vmem:[%s164_s28 + $0x8] sm:$0xff]  ;;  %s1087_s22 = scalar_lea.vmem %s1086_s21, 256  ;;  %p1088_p0 = scmp.lt.s32.totalorder %s1503_s4, %s1086_s21 }
  0x1a   : > { %p1089_p1 = scmp.lt.s32.totalorder %s1087_s22, %s1081_s17 }
  0x1c   : > { %p1090_p2 = por %p1089_p1, %p1088_p0 }
  0x1d   : > { %172 = vmax.xlane.f32.xlu0 %v167_v1 }
  0x1e   : > { %p1091_p3 = pnand %p1090_p2, %p1084_p13 }
  0x33   : > { %191 = vperm.xlu0 %1043, %v168_v3  }
  0xa6   : > { %v171_v4 = vpop.xlane.xlu0 %170 }
  0xa7   : > { %v174_v5 = vsub.f32 %v166_v0, %v171_v4 }
  0xa9   : > { %v176_v6 = vmul.f32 1.442695, %v174_v5 }
  0xaa   : > { %v173_v7 = vpop.xlane.xlu0 %172 }
  0xab   : > { %1045 = vpow2.f32 %v176_v6  ;;  %v175_v8 = vsub.f32 %v167_v1, %v173_v7 }
  0xad   : > { %v178_v9 = vmul.f32 1.442695, %v175_v8 }
  0xaf   : > { %1047 = vpow2.f32 %v178_v9 }
  0xb5   : > { %v1046_v10 = vpop.eup %1045 }
  0xb6   : > { %180 = vadd.xlane.f32.xlu1 %v1046_v10 }
  0xb9   : > { %v1048_v11 = vpop.eup %1047 }
  0xba   : > { %182 = vadd.xlane.f32.xlu1 %v1048_v11 }
  0xcb   : > { %194 = vperm.xlu1 %1044, %v169_v12  }
 0x143   : > { %v181_v13 = vpop.xlane.xlu1 %180 }
 0x144   : > { %1049 = vrcp.f32 %v181_v13 }
 0x147   : > { %v183_v14 = vpop.xlane.xlu1 %182 }
 0x148   : > { %1051 = vrcp.f32 %v183_v14 }
 0x14e   : > { %v1050_v15 = vpop.eup %1049 }
 0x14f   : > { %v1224_v16 = vmul.f32 %v1050_v15, %v1046_v10 }
 0x151   : > { %v215_v17 = vand.u32 2139095040, %v1224_v16  ;;  %v212_v18 = vand.u32 2147483647, %v1224_v16  ;;  %vm214_vm14 = vcmp.lt.s32.totalorder %v1224_v16, 0 }
 0x152   : > { %v1052_v19 = vpop.eup %1051 }
 0x153   : > { %v216_v20 = vshrl.u32 %v215_v17, 23  ;;  %v1228_v21 = vmul.f32 %v1052_v19, %v1048_v11  ;;  %v219_v22 = vand.u32 8388607, %v212_v18  ;;  %vm213_vm15 = vcmp.le.f32.partialorder %v212_v18, 0.7853982 }
 0x155   : > { %v942_v23 = vadd.s32 4294967169, %v216_v20  ;;  %v319_v24 = vand.u32 2139095040, %v1228_v21  ;;  %v316_v25 = vand.u32 2147483647, %v1228_v21  ;;  %v220_v28 = vor.u32 8388608, %v219_v22 }
 0x157   : > { %v222_v26 = vadd.s32 1, %v942_v23  ;;  %v320_v27 = vshrl.u32 %v319_v24, 23  ;;  %v323_v29 = vand.u32 8388607, %v316_v25  ;;  %v1236_v35 = vshll.u32 %v220_v28, 8 }
 0x159   : > { %vm223_vm0 = vcmp.gt.s32.totalorder %v222_v26, 0  ;;  %v946_v30 = vadd.s32 4294967169, %v320_v27  ;;  %v324_v32 = vor.u32 8388608, %v323_v29 }
 0x15a   : > { %v224_v31 = vsel %vm223_vm0, %v222_v26, 0  ;;  %vm318_vm0 = vcmp.lt.s32.totalorder %v1228_v21, 0 }
 0x15b   : > { %v226_v33 = vand.u32 31, %v224_v31  ;;  %v326_v34 = vadd.s32 1, %v946_v30  ;;  %v225_v36 = vshrl.u32 %v224_v31, 5  ;;  %v1238_v38 = vshll.u32 %v324_v32, 8 }
 0x15d   : > { %v227_v37 = vsub.s32 32, %v226_v33  ;;  %vm327_vm1 = vcmp.gt.s32.totalorder %v326_v34, 0  ;;  %v229_v41 = vshll.u32 %v1146_v40, %v226_v33  ;;  %v232_v43 = vshll.u32 %v1147_v42, %v226_v33 }
 0x15e   : > { %v328_v39 = vsel %vm327_vm1, %v326_v34, 0  ;;  %v235_v45 = vshll.u32 %v1148_v44, %v226_v33  ;;  %v238_v49 = vshll.u32 %v1149_v48, %v226_v33  ;;  %v241_v51 = vshll.u32 %v1150_v50, %v226_v33 }
 0x15f   : > { %v330_v46 = vand.u32 31, %v328_v39  ;;  %v230_v47 = vshrl.u32 %v1147_v42, %v227_v37  ;;  %v233_v52 = vshrl.u32 %v1148_v44, %v227_v37  ;;  %v236_v53 = vshrl.u32 %v1149_v48, %v227_v37 }
 0x160   : > { %v239_v54 = vshrl.u32 %v1150_v50, %v227_v37  ;;  %v242_v56 = vshrl.u32 %v1151_v55, %v227_v37  ;;  %v1250_v57 = vshrl.u32 %v328_v39, 5  ;;  %v228_v59 = vshrl.u32 %v1146_v40, %v227_v37 }
 0x161   : > { %v331_v58 = vsub.s32 32, %v330_v46  ;;  %v231_v60 = vor.u32 %v230_v47, %v229_v41  ;;  %v234_v61 = vor.u32 %v233_v52, %v232_v43  ;;  %v237_v62 = vor.u32 %v236_v53, %v235_v45 }
 0x162   : > { %v240_v63 = vor.u32 %v239_v54, %v238_v49  ;;  %v243_v0 = vor.u32 %v242_v56, %v241_v51  ;;  %vm244_vm2 = vcmp.lt.s32.totalorder %v225_v36, 1  ;;  %vm245_vm3 = vcmp.lt.s32.totalorder %v225_v36, 2 }
 0x163   : > { %vm246_vm4 = vcmp.lt.s32.totalorder %v225_v36, 3  ;;  %vm247_vm5 = vcmp.lt.s32.totalorder %v225_v36, 4  ;;  %v252_v2 = vsel %vm244_vm2, %v231_v60, %v234_v61  ;;  %v256_v4 = vsel %vm244_vm2, %v234_v61, %v237_v62 }
 0x164   : > { %v249_v1 = vsel %vm247_vm5, %v237_v62, 2102212464  ;;  %v253_v3 = vsel %vm247_vm5, %v240_v63, 920167782  ;;  %v248_v5 = vsel %vm244_vm2, %v228_v59, %v231_v60  ;;  %v257_v8 = vsel %vm247_vm5, %v243_v0, 1326507024 }
 0x165   : > { %v250_v6 = vsel %vm246_vm4, %v234_v61, %v249_v1  ;;  %v254_v7 = vsel %vm246_vm4, %v237_v62, %v253_v3  ;;  %v258_v10 = vsel %vm246_vm4, %v240_v63, %v257_v8  ;;  %v333_v11 = vshll.u32 %v1146_v40, %v330_v46 }
 0x166   : > { %v255_v9 = vsel %vm245_vm3, %v252_v2, %v254_v7  ;;  %v334_v12 = vshrl.u32 %v1147_v42, %v331_v58  ;;  %v259_v13 = vsel %vm245_vm3, %v256_v4, %v258_v10  ;;  %v332_v17 = vshrl.u32 %v1146_v40, %v331_v58 }
 0x167   : > { %v1258_v14 = vmul.u32.u64.low %v1236_v35, %v255_v9  ;;  %v1259_v15 = vmul.u32.u64.high %v1236_v35, %v255_v9, %v1258_v14  ;;  %v251_v19 = vsel %vm245_vm3, %v248_v5, %v250_v6  ;;  %v336_v24 = vshll.u32 %v1147_v42, %v330_v46 }
 0x168   : > { %v1265_v20 = vmul.u32.u64.low %v1236_v35, %v259_v13  ;;  %v1266_v22 = vmul.u32.u64.high %v1236_v35, %v259_v13, %v1265_v20  ;;  %v335_v23 = vor.u32 %v334_v12, %v333_v11  ;;  %v337_v26 = vshrl.u32 %v1148_v44, %v331_v58 }
 0x169   : > { %v339_v27 = vshll.u32 %v1148_v44, %v330_v46  ;;  %v340_v28 = vshrl.u32 %v1149_v48, %v331_v58  ;;  %v342_v29 = vshll.u32 %v1149_v48, %v330_v46  ;;  %v343_v30 = vshrl.u32 %v1150_v50, %v331_v58 }
 0x16a   : > { %v345_v31 = vshll.u32 %v1150_v50, %v330_v46  ;;  %v346_v32 = vshrl.u32 %v1151_v55, %v331_v58  ;;  %v267_v33 = vmul.u32 %v1236_v35, %v251_v19  ;;  %v270_v34 = vadd.s32 1, %v1259_v15 }
 0x16b   : > { %v338_v36 = vor.u32 %v337_v26, %v336_v24  ;;  %v341_v37 = vor.u32 %v340_v28, %v339_v27  ;;  %vm269_vm6 = vc.u32 %v1266_v22, %v1258_v14  ;;  %v344_v39 = vor.u32 %v343_v30, %v342_v29 }
 0x16c   : > { %v347_v41 = vor.u32 %v346_v32, %v345_v31  ;;  %vm348_vm7 = vcmp.lt.s32.totalorder %v1250_v57, 1  ;;  %v271_v43 = vsel %vm269_vm6, %v270_v34, %v1259_v15  ;;  %vm349_vm8 = vcmp.lt.s32.totalorder %v1250_v57, 2 }
 0x16d   : > { %vm350_vm9 = vcmp.lt.s32.totalorder %v1250_v57, 3  ;;  %vm351_vm10 = vcmp.lt.s32.totalorder %v1250_v57, 4  ;;  %v272_v35 = vadd.s32 %v271_v43, %v267_v33  ;;  %v356_v46 = vsel %vm348_vm7, %v335_v23, %v338_v36 }
 0x16e   : > { %v353_v45 = vsel %vm351_vm10, %v341_v37, 2102212464  ;;  %v357_v47 = vsel %vm351_vm10, %v344_v39, 920167782  ;;  %v352_v49 = vsel %vm348_vm7, %v332_v17, %v335_v23  ;;  %v360_v52 = vsel %vm348_vm7, %v338_v36, %v341_v37 }
 0x16f   : > { %v358_v51 = vsel %vm350_vm9, %v341_v37, %v357_v47  ;;  %v361_v53 = vsel %vm351_vm10, %v347_v41, 1326507024  ;;  %v273_v54 = vadd.s32 536870912, %v272_v35  ;;  %v354_v56 = vsel %vm350_vm9, %v338_v36, %v353_v45 }
 0x170   : > { %v359_v58 = vsel %vm349_vm8, %v356_v46, %v358_v51  ;;  %v362_v59 = vsel %vm350_vm9, %v344_v39, %v361_v53  ;;  %v355_v2 = vsel %vm349_vm8, %v352_v49, %v354_v56  ;;  %v268_v20 = vadd.s32 %v1258_v14, %v1266_v22 }
 0x171   : > { %v363_v60 = vsel %vm349_vm8, %v360_v52, %v362_v59  ;;  %v1290_v61 = vmul.u32.u64.low %v1238_v38, %v359_v58  ;;  %v1291_v62 = vmul.u32.u64.high %v1238_v38, %v359_v58, %v1290_v61  ;;  %v274_v63 = vshrl.u32 %v273_v54, 30 }
 0x172   : > { %v1294_v0 = vmul.u32.u64.low %v1238_v38, %v363_v60  ;;  %v1295_v1 = vmul.u32.u64.high %v1238_v38, %v363_v60, %v1294_v0  ;;  %v371_v6 = vmul.u32 %v1238_v38, %v355_v2  ;;  %vm1313_vm1 = vcmp.le.f32.partialorder %v316_v25, 0.7853982 }
 0x173   : > { %v275_v3 = vshll.u32 %v274_v63, 30  ;;  %v374_v4 = vadd.s32 1, %v1291_v62  ;;  %v298_v41 = vsub.s32 4, %v274_v63  ;;  %vm304_vm5 = vweird.f32 %v1224_v16 }
 0x174   : > { %vm373_vm11 = vc.u32 %v1295_v1, %v1290_v61  ;;  %v372_v14 = vadd.s32 %v1290_v61, %v1295_v1  ;;  %vm408_vm10 = vweird.f32 %v1228_v21 }
 0x175   : > { %v276_v5 = vsub.s32 %v272_v35, %v275_v3  ;;  %v375_v7 = vsel %vm373_vm11, %v374_v4, %v1291_v62  ;;  %v299_v52 = vsel %vm214_vm14, %v298_v41, %v274_v63 }
 0x176   : > { %v376_v9 = vadd.s32 %v375_v7, %v371_v6  ;;  %v301_v58 = vsel %vm213_vm15, 0, %v299_v52 }
 0x177   : > { %v278_v8 = vsub.s32 0, %v276_v5  ;;  %v305_v62 = vadd.s32 3, %v301_v58 }
 0x178   : > { %v377_v11 = vadd.s32 536870912, %v376_v9 }
 0x179   : > { %v943_v10 = vmin.u32 %v278_v8, %v276_v5  ;;  %v306_v3 = vand.u32 3, %v305_v62 }
 0x17a   : > { %v378_v13 = vshrl.u32 %v377_v11, 30 }
 0x17b   : > { %v280_v12 = vclz %v943_v10  ;;  %vm311_vm2 = vcmp.eq.s32.totalorder %v306_v3, 2  ;;  %vm308_vm3 = vcmp.eq.s32.totalorder %v306_v3, 0  ;;  %vm307_vm4 = vcmp.lt.s32.totalorder %v306_v3, 2 }
 0x17c   : > { %v379_v17 = vshll.u32 %v378_v13, 30  ;;  %v402_v1 = vsub.s32 4, %v378_v13 }
 0x17d   : > { %v944_v15 = vadd.s32 4294967294, %v280_v12 }
 0x17e   : > { %v380_v19 = vsub.s32 %v376_v9, %v379_v17  ;;  %v403_v4 = vsel %vm318_vm0, %v402_v1, %v378_v13 }
 0x17f   : > { %vm945_vm12 = vcmp.lt.s32.totalorder %v944_v15, 0  ;;  %v405_v10 = vsel %vm1313_vm1, 0, %v403_v4 }
 0x180   : > { %v283_v57 = vsel %vm945_vm12, 0, %v944_v15  ;;  %v382_v24 = vsub.s32 0, %v380_v19  ;;  %v409_v13 = vadd.s32 3, %v405_v10 }
 0x181   : > { %v284_v23 = vsub.s32 32, %v283_v57  ;;  %v288_v38 = vsub.s32 4294967266, %v283_v57  ;;  %v285_v26 = vshll.u32 %v276_v5, %v283_v57 }
 0x182   : > { %v947_v29 = vmin.u32 %v382_v24, %v380_v19 }
 0x183   : > { %v286_v27 = vshrl.u32 %v268_v20, %v284_v23  ;;  %v289_v28 = vadd.s32 127, %v288_v38 }
 0x184   : > { %v384_v32 = vclz %v947_v29 }
 0x185   : > { %v287_v30 = vor.u32 %v286_v27, %v285_v26  ;;  %v290_v31 = vshll.u32 %v289_v28, 23 }
 0x186   : > { %v948_v34 = vadd.s32 4294967294, %v384_v32 }
 0x187   : > { %v291_v33 = vor.u32 4788187, %v290_v31  ;;  %v294_v37 = vcvt.s32.f32 %v287_v30 }
 0x188   : > { %vm949_vm13 = vcmp.lt.s32.totalorder %v948_v34, 0 }
 0x189   : > { %v292_v36 = vand.u32 2147483647, %v291_v33  ;;  %v387_v43 = vsel %vm949_vm13, 0, %v948_v34 }
 0x18a   : > { %v388_v22 = vsub.s32 32, %v387_v43  ;;  %v392_v35 = vsub.s32 4294967266, %v387_v43  ;;  %v389_v46 = vshll.u32 %v380_v19, %v387_v43  ;;  %v410_v19 = vand.u32 3, %v409_v13 }
 0x18b   : > { %v295_v39 = vmul.f32 %v294_v37, %v292_v36 }
 0x18c   : > { %v390_v47 = vshrl.u32 %v372_v14, %v388_v22  ;;  %v393_v49 = vadd.s32 127, %v392_v35  ;;  %vm415_vm6 = vcmp.eq.s32.totalorder %v410_v19, 2  ;;  %vm412_vm7 = vcmp.eq.s32.totalorder %v410_v19, 0 }
 0x18d   : > { %v296_v45 = vxor.u32 2147483648, %v295_v39  ;;  %vm411_vm8 = vcmp.lt.s32.totalorder %v410_v19, 2 }
 0x18e   : > { %v391_v54 = vor.u32 %v390_v47, %v389_v46  ;;  %v394_v56 = vshll.u32 %v393_v49, 23 }
 0x18f   : > { %v297_v51 = vsel %vm214_vm14, %v296_v45, %v295_v39 }
 0x190   : > { %v300_v53 = vsel %vm213_vm15, %v1224_v16, %v297_v51  ;;  %v395_v59 = vor.u32 4788187, %v394_v56  ;;  %v398_v61 = vcvt.s32.f32 %v391_v54 }
 0x191   : > { %1053 = vcosq.f32 %v300_v53 }
 0x192   : > { %1055 = vsinq.f32 %v300_v53  ;;  %v396_v60 = vand.u32 2147483647, %v395_v59 }
 0x194   : > { %v399_v0 = vmul.f32 %v398_v61, %v396_v60 }
 0x196   : > { %v400_v2 = vxor.u32 2147483648, %v399_v0 }
 0x198   : > { %v401_v63 = vsel %vm318_vm0, %v400_v2, %v399_v0 }
 0x199   : > { %v404_v6 = vsel %vm1313_vm1, %v1228_v21, %v401_v63 }
 0x19a   : > { %1057 = vcosq.f32 %v404_v6 }
 0x19b   : > { %v1054_v5 = vpop.eup %1053  ;;  %1059 = vsinq.f32 %v404_v6 }
 0x19c   : > { %v1056_v7 = vpop.eup %1055  ;;  %v312_v8 = vxor.u32 2147483648, %v1054_v5 }
 0x19d   : > { %v309_v9 = vxor.u32 2147483648, %v1056_v7 }
 0x19e   : > { %v313_v25 = vsel %vm311_vm2, %v312_v8, %v1056_v7 }
 0x19f   : > { %v310_v11 = vsel %vm308_vm3, %v1054_v5, %v309_v9 }
 0x1a0   : > { %v314_v12 = vsel %vm307_vm4, %v310_v11, %v313_v25 }
 0x1a1   : > { %v1323_v15 = vsel %vm304_vm5, nan, %v314_v12 }
 0x1a2   : > { %v423_v17 = vand.u32 2139095040, %v1323_v15  ;;  %v420_v57 = vand.u32 2147483647, %v1323_v15 }
 0x1a4   : > { %v424_v20 = vshrl.u32 %v423_v17, 23  ;;  %v1058_v23 = vpop.eup %1057  ;;  %v427_v27 = vand.u32 8388607, %v420_v57 }
 0x1a5   : > { %v1060_v24 = vpop.eup %1059  ;;  %v416_v26 = vxor.u32 2147483648, %v1058_v23 }
 0x1a6   : > { %v950_v38 = vadd.s32 4294967169, %v424_v20  ;;  %v413_v28 = vxor.u32 2147483648, %v1060_v24  ;;  %v428_v33 = vor.u32 8388608, %v427_v27 }
 0x1a7   : > { %v417_v30 = vsel %vm415_vm6, %v416_v26, %v1060_v24 }
 0x1a8   : > { %v430_v29 = vadd.s32 1, %v950_v38  ;;  %v414_v31 = vsel %vm412_vm7, %v1058_v23, %v413_v28  ;;  %v468_v22 = vshll.u32 %v428_v33, 8  ;;  %vm422_vm7 = vcmp.lt.s32.totalorder %v1323_v15, 0 }
 0x1a9   : > { %v418_v32 = vsel %vm411_vm8, %v414_v31, %v417_v30  ;;  %vm1392_vm8 = vcmp.le.f32.partialorder %v420_v57, 0.7853982 }
 0x1aa   : > { %vm431_vm9 = vcmp.gt.s32.totalorder %v430_v29, 0  ;;  %v1330_v36 = vsel %vm408_vm10, nan, %v418_v32 }
 0x1ab   : > { %v432_v34 = vsel %vm431_vm9, %v430_v29, 0  ;;  %v526_v35 = vand.u32 2139095040, %v1330_v36  ;;  %v523_v19 = vand.u32 2147483647, %v1330_v36 }
 0x1ac   : > { %v434_v37 = vand.u32 31, %v432_v34  ;;  %v433_v39 = vshrl.u32 %v432_v34, 5 }
 0x1ad   : > { %v527_v62 = vshrl.u32 %v526_v35, 23  ;;  %v530_v27 = vand.u32 8388607, %v523_v19 }
 0x1ae   : > { %v435_v41 = vsub.s32 32, %v434_v37  ;;  %v437_v43 = vshll.u32 %v1146_v40, %v434_v37  ;;  %v440_v14 = vshll.u32 %v1147_v42, %v434_v37  ;;  %v443_v47 = vshll.u32 %v1148_v44, %v434_v37 }
 0x1af   : > { %v446_v51 = vshll.u32 %v1149_v48, %v434_v37  ;;  %v449_v53 = vshll.u32 %v1150_v50, %v434_v37  ;;  %vm452_vm11 = vcmp.lt.s32.totalorder %v433_v39, 1  ;;  %vm455_vm12 = vcmp.lt.s32.totalorder %v433_v39, 4 }
 0x1b0   : > { %v438_v45 = vshrl.u32 %v1147_v42, %v435_v41  ;;  %v441_v46 = vshrl.u32 %v1148_v44, %v435_v41  ;;  %v444_v49 = vshrl.u32 %v1149_v48, %v435_v41  ;;  %v447_v52 = vshrl.u32 %v1150_v50, %v435_v41 }
 0x1b1   : > { %v450_v54 = vshrl.u32 %v1151_v55, %v435_v41  ;;  %v436_v0 = vshrl.u32 %v1146_v40, %v435_v41  ;;  %vm454_vm13 = vcmp.lt.s32.totalorder %v433_v39, 3  ;;  %v954_v4 = vadd.s32 4294967169, %v527_v62 }
 0x1b2   : > { %v439_v56 = vor.u32 %v438_v45, %v437_v43  ;;  %v442_v58 = vor.u32 %v441_v46, %v440_v14  ;;  %v445_v59 = vor.u32 %v444_v49, %v443_v47  ;;  %v448_v60 = vor.u32 %v447_v52, %v446_v51 }
 0x1b3   : > { %v451_v61 = vor.u32 %v450_v54, %v449_v53  ;;  %vm453_vm14 = vcmp.lt.s32.totalorder %v433_v39, 2  ;;  %v533_v25 = vadd.s32 1, %v954_v4  ;;  %v531_v46 = vor.u32 8388608, %v530_v27 }
 0x1b4   : > { %v457_v1 = vsel %vm455_vm12, %v445_v59, 2102212464  ;;  %v460_v2 = vsel %vm452_vm11, %v439_v56, %v442_v58  ;;  %v464_v3 = vsel %vm452_vm11, %v442_v58, %v445_v59  ;;  %v461_v18 = vsel %vm455_vm12, %v448_v60, 920167782 }
 0x1b5   : > { %v465_v63 = vsel %vm455_vm12, %v451_v61, 1326507024  ;;  %v456_v5 = vsel %vm452_vm11, %v436_v0, %v439_v56  ;;  %v462_v6 = vsel %vm454_vm13, %v445_v59, %v461_v18  ;;  %v458_v8 = vsel %vm454_vm13, %v442_v58, %v457_v1 }
 0x1b6   : > { %v466_v7 = vsel %vm454_vm13, %v448_v60, %v465_v63  ;;  %v463_v9 = vsel %vm453_vm14, %v460_v2, %v462_v6  ;;  %vm534_vm15 = vcmp.gt.s32.totalorder %v533_v25, 0  ;;  %v459_v20 = vsel %vm453_vm14, %v456_v5, %v458_v8 }
 0x1b7   : > { %v467_v10 = vsel %vm453_vm14, %v464_v3, %v466_v7  ;;  %v1347_v13 = vmul.u32.u64.low %v468_v22, %v463_v9  ;;  %v1348_v17 = vmul.u32.u64.high %v468_v22, %v463_v9, %v1347_v13  ;;  %v535_v23 = vsel %vm534_vm15, %v533_v25, 0 }
 0x1b8   : > { %v1344_v11 = vmul.u32.u64.low %v468_v22, %v467_v10  ;;  %v1345_v12 = vmul.u32.u64.high %v468_v22, %v467_v10, %v1344_v11  ;;  %v537_v38 = vand.u32 31, %v535_v23  ;;  %v475_v26 = vmul.u32 %v468_v22, %v459_v20 }
 0x1b9   : > { %v478_v24 = vadd.s32 1, %v1348_v17  ;;  %v536_v28 = vshrl.u32 %v535_v23, 5  ;;  %v571_v18 = vshll.u32 %v531_v46, 8  ;;  %vm525_vm13 = vcmp.lt.s32.totalorder %v1330_v36, 0 }
 0x1ba   : > { %vm477_vm0 = vc.u32 %v1345_v12, %v1347_v13  ;;  %v538_v29 = vsub.s32 32, %v537_v38  ;;  %v540_v31 = vshll.u32 %v1146_v40, %v537_v38  ;;  %v543_v32 = vshll.u32 %v1147_v42, %v537_v38 }
 0x1bb   : > { %v479_v30 = vsel %vm477_vm0, %v478_v24, %v1348_v17  ;;  %v546_v33 = vshll.u32 %v1148_v44, %v537_v38  ;;  %v549_v41 = vshll.u32 %v1149_v48, %v537_v38  ;;  %v552_v22 = vshll.u32 %v1150_v50, %v537_v38 }
 0x1bc   : > { %v480_v34 = vadd.s32 %v479_v30, %v475_v26  ;;  %v541_v37 = vshrl.u32 %v1147_v42, %v538_v29  ;;  %v544_v39 = vshrl.u32 %v1148_v44, %v538_v29  ;;  %v547_v43 = vshrl.u32 %v1149_v48, %v538_v29 }
 0x1bd   : > { %v550_v14 = vshrl.u32 %v1150_v50, %v538_v29  ;;  %v553_v35 = vshrl.u32 %v1151_v55, %v538_v29  ;;  %vm555_vm1 = vcmp.lt.s32.totalorder %v536_v28, 1  ;;  %vm558_vm2 = vcmp.lt.s32.totalorder %v536_v28, 4 }
 0x1be   : > { %v481_v45 = vadd.s32 536870912, %v480_v34  ;;  %v542_v47 = vor.u32 %v541_v37, %v540_v31  ;;  %v545_v49 = vor.u32 %v544_v39, %v543_v32  ;;  %v548_v51 = vor.u32 %v547_v43, %v546_v33 }
 0x1bf   : > { %v551_v52 = vor.u32 %v550_v14, %v549_v41  ;;  %v554_v53 = vor.u32 %v553_v35, %v552_v22  ;;  %vm557_vm3 = vcmp.lt.s32.totalorder %v536_v28, 3  ;;  %vm556_vm4 = vcmp.lt.s32.totalorder %v536_v28, 2 }
 0x1c0   : > { %v1368_v54 = vshrl.u32 %v481_v45, 30  ;;  %v563_v56 = vsel %vm555_vm1, %v542_v47, %v545_v49  ;;  %v567_v59 = vsel %vm555_vm1, %v545_v49, %v548_v51  ;;  %v560_v62 = vsel %vm558_vm2, %v548_v51, 2102212464 }
 0x1c1   : > { %v564_v58 = vsel %vm558_vm2, %v551_v52, 920167782  ;;  %v568_v60 = vsel %vm558_vm2, %v554_v53, 1326507024  ;;  %v539_v1 = vshrl.u32 %v1146_v40, %v538_v29  ;;  %v561_v6 = vsel %vm557_vm3, %v545_v49, %v560_v62 }
 0x1c2   : > { %v483_v61 = vshll.u32 %v1368_v54, 30  ;;  %v565_v0 = vsel %vm557_vm3, %v548_v51, %v564_v58  ;;  %v569_v3 = vsel %vm557_vm3, %v551_v52, %v568_v60  ;;  %v476_v31 = vadd.s32 %v1347_v13, %v1345_v12 }
 0x1c3   : > { %v566_v2 = vsel %vm556_vm4, %v563_v56, %v565_v0  ;;  %v570_v4 = vsel %vm556_vm4, %v567_v59, %v569_v3  ;;  %v559_v5 = vsel %vm555_vm1, %v539_v1, %v542_v47  ;;  %v506_v58 = vsub.s32 4, %v1368_v54 }
 0x1c4   : > { %v484_v63 = vsub.s32 %v480_v34, %v483_v61  ;;  %v1377_v7 = vmul.u32.u64.low %v571_v18, %v570_v4  ;;  %v1378_v8 = vmul.u32.u64.high %v571_v18, %v570_v4, %v1377_v7  ;;  %v562_v17 = vsel %vm556_vm4, %v559_v5, %v561_v6 }
 0x1c5   : > { %v1380_v10 = vmul.u32.u64.low %v571_v18, %v566_v2  ;;  %v1381_v25 = vmul.u32.u64.high %v571_v18, %v566_v2, %v1380_v10  ;;  %v578_v38 = vmul.u32 %v571_v18, %v562_v17  ;;  %v507_v57 = vsel %vm422_vm7, %v506_v58, %v1368_v54 }
 0x1c6   : > { %v486_v9 = vsub.s32 0, %v484_v63  ;;  %v509_v18 = vsel %vm1392_vm8, 0, %v507_v57  ;;  %vm512_vm14 = vweird.f32 %v1323_v15  ;;  %vm524_vm15 = vcmp.le.f32.partialorder %v523_v19, 0.7853982 }
 0x1c7   : > { %vm580_vm5 = vc.u32 %v1378_v8, %v1380_v10  ;;  %v581_v23 = vadd.s32 1, %v1381_v25  ;;  %v579_v61 = vadd.s32 %v1380_v10, %v1378_v8  ;;  %v513_v6 = vand.u32 3, %v509_v18 }
 0x1c8   : > { %v951_v11 = vmin.u32 %v486_v9, %v484_v63  ;;  %vm615_vm1 = vweird.f32 %v1330_v36 }
 0x1c9   : > { %v582_v26 = vsel %vm580_vm5, %v581_v23, %v1381_v25  ;;  %vm518_vm10 = vcmp.eq.s32.totalorder %v513_v6, 2  ;;  %vm515_vm11 = vcmp.eq.s32.totalorder %v513_v6, 0  ;;  %vm514_vm12 = vcmp.lt.s32.totalorder %v513_v6, 2 }
 0x1ca   : > { %v488_v20 = vclz %v951_v11  ;;  %v583_v27 = vadd.s32 %v582_v26, %v578_v38 }
 0x1cc   : > { %v952_v24 = vadd.s32 4294967294, %v488_v20  ;;  %v584_v30 = vadd.s32 536870912, %v583_v27 }
 0x1ce   : > { %vm953_vm6 = vcmp.lt.s32.totalorder %v952_v24, 0  ;;  %v585_v28 = vshrl.u32 %v584_v30, 30 }
 0x1cf   : > { %v491_v29 = vsel %vm953_vm6, 0, %v952_v24 }
 0x1d0   : > { %v492_v32 = vsub.s32 32, %v491_v29  ;;  %v496_v33 = vsub.s32 4294967266, %v491_v29  ;;  %v493_v34 = vshll.u32 %v484_v63, %v491_v29  ;;  %v586_v41 = vshll.u32 %v585_v28, 30 }
 0x1d1   : > { %v609_v38 = vsub.s32 4, %v585_v28 }
 0x1d2   : > { %v494_v37 = vshrl.u32 %v476_v31, %v492_v32  ;;  %v497_v39 = vadd.s32 127, %v496_v33  ;;  %v587_v22 = vsub.s32 %v583_v27, %v586_v41 }
 0x1d3   : > { %v610_v31 = vsel %vm525_vm13, %v609_v38, %v585_v28 }
 0x1d4   : > { %v495_v43 = vor.u32 %v494_v37, %v493_v34  ;;  %v498_v14 = vshll.u32 %v497_v39, 23  ;;  %v589_v45 = vsub.s32 0, %v587_v22  ;;  %v612_v33 = vsel %vm524_vm15, 0, %v610_v31 }
 0x1d5   : > { %v616_v39 = vand.u32 3, %v612_v33 }
 0x1d6   : > { %v499_v35 = vor.u32 4788187, %v498_v14  ;;  %v502_v47 = vcvt.s32.f32 %v495_v43  ;;  %v955_v49 = vmin.u32 %v589_v45, %v587_v22 }
 0x1d7   : > { %vm617_vm2 = vcmp.lt.s32.totalorder %v616_v39, 2  ;;  %vm618_vm3 = vcmp.eq.s32.totalorder %v616_v39, 0  ;;  %vm621_vm4 = vcmp.eq.s32.totalorder %v616_v39, 2 }
 0x1d8   : > { %v500_v46 = vand.u32 2147483647, %v499_v35  ;;  %v591_v52 = vclz %v955_v49 }
 0x1da   : > { %v503_v51 = vmul.f32 %v502_v47, %v500_v46  ;;  %v956_v12 = vadd.s32 4294967294, %v591_v52 }
 0x1dc   : > { %v504_v53 = vxor.u32 2147483648, %v503_v51  ;;  %vm957_vm9 = vcmp.lt.s32.totalorder %v956_v12, 0 }
 0x1dd   : > { %v594_v60 = vsel %vm957_vm9, 0, %v956_v12 }
 0x1de   : > { %v505_v56 = vsel %vm422_vm7, %v504_v53, %v503_v51  ;;  %v595_v62 = vsub.s32 32, %v594_v60  ;;  %v599_v0 = vsub.s32 4294967266, %v594_v60  ;;  %v596_v1 = vshll.u32 %v587_v22, %v594_v60 }
 0x1df   : > { %v508_v59 = vsel %vm1392_vm8, %v1323_v15, %v505_v56 }
 0x1e0   : > { %1061 = vcosq.f32 %v508_v59  ;;  %v597_v2 = vshrl.u32 %v579_v61, %v595_v62  ;;  %v600_v3 = vadd.s32 127, %v599_v0 }
 0x1e1   : > { %1063 = vsinq.f32 %v508_v59 }
 0x1e2   : > { %v598_v63 = vor.u32 %v597_v2, %v596_v1  ;;  %v601_v4 = vshll.u32 %v600_v3, 23 }
 0x1e4   : > { %v602_v5 = vor.u32 4788187, %v601_v4  ;;  %v605_v9 = vcvt.s32.f32 %v598_v63 }
 0x1e6   : > { %v603_v7 = vand.u32 2147483647, %v602_v5 }
 0x1e8   : > { %v606_v8 = vmul.f32 %v605_v9, %v603_v7 }
 0x1ea   : > { %v1062_v25 = vpop.eup %1061  ;;  %v607_v20 = vxor.u32 2147483648, %v606_v8 }
 0x1eb   : > { %v1064_v11 = vpop.eup %1063  ;;  %v519_v17 = vxor.u32 2147483648, %v1062_v25 }
 0x1ec   : > { %v516_v10 = vxor.u32 2147483648, %v1064_v11  ;;  %v608_v26 = vsel %vm525_vm13, %v607_v20, %v606_v8 }
 0x1ed   : > { %v520_v54 = vsel %vm518_vm10, %v519_v17, %v1064_v11  ;;  %v611_v29 = vsel %vm524_vm15, %v1330_v36, %v608_v26 }
 0x1ee   : > { %v517_v23 = vsel %vm515_vm11, %v1062_v25, %v516_v10  ;;  %1065 = vcosq.f32 %v611_v29 }
 0x1ef   : > { %v521_v24 = vsel %vm514_vm12, %v517_v23, %v520_v54  ;;  %1067 = vsinq.f32 %v611_v29 }
 0x1f0   : > { %v1408_v27 = vsel %vm512_vm14, nan, %v521_v24 }
 0x1f1   : > { %v629_v30 = vand.u32 2139095040, %v1408_v27  ;;  %v626_v34 = vand.u32 2147483647, %v1408_v27 }
 0x1f3   : > { %v630_v32 = vshrl.u32 %v629_v30, 23  ;;  %v633_v19 = vand.u32 8388607, %v626_v34 }
 0x1f5   : > { %v958_v37 = vadd.s32 4294967169, %v630_v32  ;;  %v634_v45 = vor.u32 8388608, %v633_v19 }
 0x1f7   : > { %v636_v15 = vadd.s32 1, %v958_v37  ;;  %v674_v2 = vshll.u32 %v634_v45, 8 }
 0x1f8   : > { %v1066_v43 = vpop.eup %1065 }
 0x1f9   : > { %vm637_vm0 = vcmp.gt.s32.totalorder %v636_v15, 0  ;;  %v1068_v22 = vpop.eup %1067  ;;  %v622_v28 = vxor.u32 2147483648, %v1066_v43 }
 0x1fa   : > { %v638_v41 = vsel %vm637_vm0, %v636_v15, 0  ;;  %v619_v35 = vxor.u32 2147483648, %v1068_v22 }
 0x1fb   : > { %v640_v14 = vand.u32 31, %v638_v41  ;;  %v639_v46 = vshrl.u32 %v638_v41, 5  ;;  %v623_v49 = vsel %vm621_vm4, %v622_v28, %v1068_v22 }
 0x1fc   : > { %v620_v12 = vsel %vm618_vm3, %v1066_v43, %v619_v35  ;;  %vm627_vm3 = vcmp.le.f32.partialorder %v626_v34, 0.7853982  ;;  %v195_v34 = vpop.permute.xlu1 %194 }
 0x1fd   : > { %v641_v47 = vsub.s32 32, %v640_v14  ;;  %v643_v51 = vshll.u32 %v1146_v40, %v640_v14  ;;  %v646_v52 = vshll.u32 %v1147_v42, %v640_v14  ;;  %v649_v53 = vshll.u32 %v1148_v44, %v640_v14 }
 0x1fe   : > { %v652_v58 = vshll.u32 %v1149_v48, %v640_v14  ;;  %v655_v61 = vshll.u32 %v1150_v50, %v640_v14  ;;  %v624_v0 = vsel %vm617_vm2, %v620_v12, %v623_v49  ;;  %vm658_vm5 = vcmp.lt.s32.totalorder %v639_v46, 1 }
 0x1ff   : > { %v644_v13 = vshrl.u32 %v1147_v42, %v641_v47  ;;  %v647_v56 = vshrl.u32 %v1148_v44, %v641_v47  ;;  %v650_v59 = vshrl.u32 %v1149_v48, %v641_v47  ;;  %v653_v60 = vshrl.u32 %v1150_v50, %v641_v47 }
 0x200   : > { %v656_v62 = vshrl.u32 %v1151_v55, %v641_v47  ;;  %v642_v4 = vshrl.u32 %v1146_v40, %v641_v47  ;;  %vm660_vm6 = vcmp.lt.s32.totalorder %v639_v46, 3  ;;  %vm661_vm7 = vcmp.lt.s32.totalorder %v639_v46, 4 }
 0x201   : > { %v645_v57 = vor.u32 %v644_v13, %v643_v51  ;;  %v648_v1 = vor.u32 %v647_v56, %v646_v52  ;;  %v651_v3 = vor.u32 %v650_v59, %v649_v53  ;;  %v654_v18 = vor.u32 %v653_v60, %v652_v58 }
 0x202   : > { %v657_v63 = vor.u32 %v656_v62, %v655_v61  ;;  %v1430_v11 = vsel %vm615_vm1, nan, %v624_v0  ;;  %vm659_vm8 = vcmp.lt.s32.totalorder %v639_v46, 2  ;;  %vm628_vm2 = vcmp.lt.s32.totalorder %v1408_v27, 0 }
 0x203   : > { %v666_v5 = vsel %vm658_vm5, %v645_v57, %v648_v1  ;;  %v663_v6 = vsel %vm661_vm7, %v651_v3, 2102212464  ;;  %v667_v7 = vsel %vm661_vm7, %v654_v18, 920167782  ;;  %v670_v9 = vsel %vm658_vm5, %v648_v1, %v651_v3 }
 0x204   : > { %v671_v25 = vsel %vm661_vm7, %v657_v63, 1326507024  ;;  %v668_v17 = vsel %vm660_vm6, %v651_v3, %v667_v7  ;;  %v662_v10 = vsel %vm658_vm5, %v642_v4, %v645_v57  ;;  %v664_v54 = vsel %vm660_vm6, %v648_v1, %v663_v6 }
 0x205   : > { %v672_v8 = vsel %vm660_vm6, %v654_v18, %v671_v25  ;;  %v669_v20 = vsel %vm659_vm8, %v666_v5, %v668_v17  ;;  %v732_v30 = vand.u32 2139095040, %v1430_v11  ;;  %v665_v31 = vsel %vm659_vm8, %v662_v10, %v664_v54 }
 0x206   : > { %v673_v23 = vsel %vm659_vm8, %v670_v9, %v672_v8  ;;  %v1435_v26 = vmul.u32.u64.low %v674_v2, %v669_v20  ;;  %v1436_v29 = vmul.u32.u64.high %v674_v2, %v669_v20, %v1435_v26  ;;  %v681_v33 = vmul.u32 %v674_v2, %v665_v31 }
 0x207   : > { %v1432_v38 = vmul.u32.u64.low %v674_v2, %v673_v23  ;;  %v1433_v24 = vmul.u32.u64.high %v674_v2, %v673_v23, %v1432_v38  ;;  %v733_v36 = vshrl.u32 %v732_v30, 23  ;;  %v729_v39 = vand.u32 2147483647, %v1430_v11 }
 0x208   : > { %v684_v32 = vadd.s32 1, %v1436_v29 }
 0x209   : > { %vm683_vm9 = vc.u32 %v1433_v24, %v1435_v26  ;;  %v962_v37 = vadd.s32 4294967169, %v733_v36  ;;  %v736_v14 = vand.u32 8388607, %v729_v39  ;;  %v682_v36 = vadd.s32 %v1435_v26, %v1433_v24 }
 0x20a   : > { %v685_v15 = vsel %vm683_vm9, %v684_v32, %v1436_v29  ;;  %vm718_vm9 = vweird.f32 %v1408_v27 }
 0x20b   : > { %v686_v19 = vadd.s32 %v685_v15, %v681_v33  ;;  %v739_v41 = vadd.s32 1, %v962_v37  ;;  %v737_v47 = vor.u32 8388608, %v736_v14  ;;  %v192_v37 = vpop.permute.xlu0 %191 }
 0x20d   : > { %v687_v43 = vadd.s32 536870912, %v686_v19  ;;  %vm740_vm10 = vcmp.gt.s32.totalorder %v739_v41, 0  ;;  %v777_v4 = vshll.u32 %v737_v47, 8  ;;  %v1152_v47 = vmov 0.0  }
 0x20e   : > { %v741_v22 = vsel %vm740_vm10, %v739_v41, 0  ;;  %vm731_vm10 = vcmp.lt.s32.totalorder %v1430_v11, 0 }
 0x20f   : > { %v1447_v28 = vshrl.u32 %v687_v43, 30  ;;  %v743_v35 = vand.u32 31, %v741_v22  ;;  %v742_v49 = vshrl.u32 %v741_v22, 5 }
 0x211   : > { %v689_v45 = vshll.u32 %v1447_v28, 30  ;;  %v744_v46 = vsub.s32 32, %v743_v35  ;;  %v746_v51 = vshll.u32 %v1146_v40, %v743_v35  ;;  %v749_v12 = vshll.u32 %v1147_v42, %v743_v35 }
 0x212   : > { %v752_v13 = vshll.u32 %v1148_v44, %v743_v35  ;;  %v755_v59 = vshll.u32 %v1149_v48, %v743_v35  ;;  %v758_v3 = vshll.u32 %v1150_v50, %v743_v35  ;;  %vm761_vm11 = vcmp.lt.s32.totalorder %v742_v49, 1 }
 0x213   : > { %v690_v52 = vsub.s32 %v686_v19, %v689_v45  ;;  %v747_v53 = vshrl.u32 %v1147_v42, %v744_v46  ;;  %v750_v56 = vshrl.u32 %v1148_v44, %v744_v46  ;;  %v753_v58 = vshrl.u32 %v1149_v48, %v744_v46 }
 0x214   : > { %v756_v60 = vshrl.u32 %v1150_v50, %v744_v46  ;;  %v759_v0 = vshrl.u32 %v1151_v55, %v744_v46  ;;  %v188_v42 = vlaneseq  ;;  %v745_v63 = vshrl.u32 %v1146_v40, %v744_v46 }
 0x215   : > { %v692_v61 = vsub.s32 0, %v690_v52  ;;  %v748_v62 = vor.u32 %v747_v53, %v746_v51  ;;  %v751_v57 = vor.u32 %v750_v56, %v749_v12  ;;  %v754_v1 = vor.u32 %v753_v58, %v752_v13 }
 0x216   : > { %v757_v2 = vor.u32 %v756_v60, %v755_v59  ;;  %v760_v44 = vor.u32 %v759_v0, %v758_v3  ;;  %vm763_vm12 = vcmp.lt.s32.totalorder %v742_v49, 3  ;;  %vm764_vm13 = vcmp.lt.s32.totalorder %v742_v49, 4 }
 0x217   : > { %v959_v18 = vmin.u32 %v692_v61, %v690_v52  ;;  %v769_v48 = vsel %vm761_vm11, %v748_v62, %v751_v57  ;;  %v766_v6 = vsel %vm764_vm13, %v754_v1, 2102212464  ;;  %v773_v9 = vsel %vm761_vm11, %v751_v57, %v754_v1 }
 0x218   : > { %v770_v7 = vsel %vm764_vm13, %v757_v2, 920167782  ;;  %v774_v55 = vsel %vm764_vm13, %v760_v44, 1326507024  ;;  %vm762_vm14 = vcmp.lt.s32.totalorder %v742_v49, 2  ;;  %v765_v50 = vsel %vm761_vm11, %v745_v63, %v748_v62 }
 0x219   : > { %v694_v5 = vclz %v959_v18  ;;  %v771_v17 = vsel %vm763_vm12, %v754_v1, %v770_v7  ;;  %v775_v8 = vsel %vm763_vm12, %v757_v2, %v774_v55  ;;  %v767_v54 = vsel %vm763_vm12, %v751_v57, %v766_v6 }
 0x21a   : > { %v772_v10 = vsel %vm762_vm14, %v769_v48, %v771_v17  ;;  %v776_v40 = vsel %vm762_vm14, %v773_v9, %v775_v8  ;;  %v1469_v31 = vand.u32 127, %v188_v42  ;;  %v768_v15 = vsel %vm762_vm14, %v765_v50, %v767_v54 }
 0x21b   : > { %v960_v25 = vadd.s32 4294967294, %v694_v5  ;;  %v1463_v20 = vmul.u32.u64.low %v777_v4, %v776_v40  ;;  %v1464_v23 = vmul.u32.u64.high %v777_v4, %v776_v40, %v1463_v20  ;;  %v784_v45 = vmul.u32 %v777_v4, %v768_v15 }
 0x21c   : > { %v1466_v29 = vmul.u32.u64.low %v777_v4, %v772_v10  ;;  %v1467_v30 = vmul.u32.u64.high %v777_v4, %v772_v10, %v1466_v29  ;;  %vm196_vm1 = vcmp.eq.s32.totalorder %v1469_v31, %v192_v37  ;;  %v202_v12 = vsub.f32 2.4092, %v1224_v16 }
 0x21d   : > { %vm961_vm15 = vcmp.lt.s32.totalorder %v960_v25, 0  ;;  %v940_v51 = vsel %vm196_vm1, 1.0, %v1152_v47  ;;  %v712_v61 = vsub.s32 4, %v1447_v28  ;;  %vm197_vm6 = vcmp.eq.s32.totalorder %v1469_v31, %v195_v34 }
 0x21e   : > { %v697_v38 = vsel %vm961_vm15, 0, %v960_v25  ;;  %vm786_vm0 = vc.u32 %v1464_v23, %v1466_v29  ;;  %v787_v14 = vadd.s32 1, %v1467_v30  ;;  %v204_v13 = vmul.f32 %v940_v51, %v1224_v16 }
 0x21f   : > { %v698_v32 = vsub.s32 32, %v697_v38  ;;  %v702_v33 = vsub.s32 4294967266, %v697_v38  ;;  %v699_v19 = vshll.u32 %v690_v52, %v697_v38  ;;  %v713_v2 = vsel %vm628_vm2, %v712_v61, %v1447_v28 }
 0x220   : > { %v788_v46 = vsel %vm786_vm0, %v787_v14, %v1467_v30  ;;  %v206_v62 = vsub.f32 %v202_v12, %v204_v13  ;;  %v715_v18 = vsel %vm627_vm3, 0, %v713_v2  ;;  %v785_v6 = vadd.s32 %v1466_v29, %v1464_v23 }
 0x221   : > { %v700_v41 = vshrl.u32 %v682_v36, %v698_v32  ;;  %v703_v43 = vadd.s32 127, %v702_v33  ;;  %v789_v26 = vadd.s32 %v788_v46, %v784_v45  ;;  %v719_v4 = vand.u32 3, %v715_v18 }
 0x222   : > { %v208_v3 = vmul.f32 1.442695, %v206_v62  ;;  %v941_v36 = vsel %vm197_vm6, 1.0, %v1152_v47  ;;  %v203_v15 = vsub.f32 2.4092, %v1228_v21  ;;  %vm821_vm15 = vweird.f32 %v1430_v11 }
 0x223   : > { %v701_v22 = vor.u32 %v700_v41, %v699_v19  ;;  %v704_v35 = vshll.u32 %v703_v43, 23  ;;  %v790_v52 = vadd.s32 536870912, %v789_v26  ;;  %vm724_vm5 = vcmp.eq.s32.totalorder %v719_v4, 2 }
 0x224   : > { %vm721_vm7 = vcmp.eq.s32.totalorder %v719_v4, 0  ;;  %vm720_vm8 = vcmp.lt.s32.totalorder %v719_v4, 2  ;;  %v205_v31 = vmul.f32 %v941_v36, %v1228_v21  ;;  %vm730_vm11 = vcmp.le.f32.partialorder %v729_v39, 0.7853982 }
 0x225   : > { %v705_v24 = vor.u32 4788187, %v704_v35  ;;  %v708_v53 = vcvt.s32.f32 %v701_v22  ;;  %v1480_v58 = vshrl.u32 %v790_v52, 30 }
 0x226   : > { %v207_v43 = vsub.f32 %v203_v15, %v205_v31 }
 0x227   : > { %v706_v49 = vand.u32 2147483647, %v705_v24  ;;  %v792_v60 = vshll.u32 %v1480_v58, 30  ;;  %v815_v14 = vsub.s32 4, %v1480_v58 }
 0x228   : > { %v210_v35 = vmul.f32 1.442695, %v207_v43 }
 0x229   : > { %v709_v56 = vmul.f32 %v708_v53, %v706_v49  ;;  %v793_v57 = vsub.s32 %v789_v26, %v792_v60  ;;  %v816_v45 = vsel %vm731_vm10, %v815_v14, %v1480_v58 }
 0x22a   : > { %v818_v46 = vsel %vm730_vm11, 0, %v816_v45 }
 0x22b   : > { %v710_v59 = vxor.u32 2147483648, %v709_v56  ;;  %v795_v16 = vsub.s32 0, %v793_v57  ;;  %v822_v21 = vand.u32 3, %v818_v46 }
 0x22d   : > { %v711_v0 = vsel %vm628_vm2, %v710_v59, %v709_v56  ;;  %v963_v42 = vmin.u32 %v795_v16, %v793_v57  ;;  %vm827_vm12 = vcmp.eq.s32.totalorder %v822_v21, 2  ;;  %vm824_vm13 = vcmp.eq.s32.totalorder %v822_v21, 0 }
 0x22e   : > { %v714_v1 = vsel %vm627_vm3, %v1408_v27, %v711_v0  ;;  %vm823_vm14 = vcmp.lt.s32.totalorder %v822_v21, 2 }
 0x22f   : > { %1069 = vcosq.f32 %v714_v1  ;;  %v797_v63 = vclz %v963_v42 }
 0x230   : > { %1071 = vsinq.f32 %v714_v1 }
 0x231   : > { %1073 = vpow2.f32 %v208_v3  ;;  %v964_v44 = vadd.s32 4294967294, %v797_v63 }
 0x233   : > { %vm965_vm4 = vcmp.lt.s32.totalorder %v964_v44, 0 }
 0x234   : > { %v800_v5 = vsel %vm965_vm4, 0, %v964_v44 }
 0x235   : > { %v801_v7 = vsub.s32 32, %v800_v5  ;;  %v805_v9 = vsub.s32 4294967266, %v800_v5  ;;  %v802_v17 = vshll.u32 %v793_v57, %v800_v5 }
 0x237   : > { %v803_v8 = vshrl.u32 %v785_v6, %v801_v7  ;;  %v806_v50 = vadd.s32 127, %v805_v9 }
 0x239   : > { %v1070_v48 = vpop.eup %1069  ;;  %v804_v54 = vor.u32 %v803_v8, %v802_v17  ;;  %v807_v20 = vshll.u32 %v806_v50, 23 }
 0x23a   : > { %v1072_v55 = vpop.eup %1071  ;;  %v725_v25 = vxor.u32 2147483648, %v1070_v48 }
 0x23b   : > { %v722_v28 = vxor.u32 2147483648, %v1072_v55  ;;  %v1074_v38 = vpop.eup %1073  ;;  %v808_v30 = vor.u32 4788187, %v807_v20  ;;  %v811_v37 = vcvt.s32.f32 %v804_v54 }
 0x23c   : > { %v726_v10 = vsel %vm724_vm5, %v725_v25, %v1072_v55 }
 0x23d   : > { %v723_v40 = vsel %vm721_vm7, %v1070_v48, %v722_v28  ;;  %v809_v33 = vand.u32 2147483647, %v808_v30 }
 0x23e   : > { %v727_v23 = vsel %vm720_vm8, %v723_v40, %v726_v10 }
 0x23f   : > { %v728_v29 = vsel %vm718_vm9, nan, %v727_v23  ;;  %v812_v19 = vmul.f32 %v811_v37, %v809_v33 }
 0x240   : > { %v832_v32 = vsub.f32 %v1074_v38, %v728_v29 }
 0x241   : > { %v813_v41 = vxor.u32 2147483648, %v812_v19 }
 0x243   : > { %v814_v27 = vsel %vm731_vm10, %v813_v41, %v812_v19 }
 0x244   : > { %v817_v22 = vsel %vm730_vm11, %v1430_v11, %v814_v27 }
 0x245   : > { %1075 = vcosq.f32 %v817_v22 }
 0x246   : > { %1077 = vsinq.f32 %v817_v22 }
 0x247   : > { %1079 = vpow2.f32 %v210_v35 }
 0x24f   : > { %v1076_v24 = vpop.eup %1075 }
 0x250   : > { %v1078_v26 = vpop.eup %1077  ;;  %v828_v47 = vxor.u32 2147483648, %v1076_v24 }
 0x251   : > { %v825_v51 = vxor.u32 2147483648, %v1078_v26  ;;  %v1080_v52 = vpop.eup %1079 }
 0x252   : > { %v829_v39 = vsel %vm827_vm12, %v828_v47, %v1078_v26 }
 0x253   : > { %v826_v49 = vsel %vm824_vm13, %v1076_v24, %v825_v51 }
 0x254   : > { %v830_v53 = vsel %vm823_vm14, %v826_v49, %v829_v39 }
 0x255   : > { %v831_v12 = vsel %vm821_vm15, nan, %v830_v53 }
 0x256   : > { %v833_v13 = vsub.f32 %v1080_v52, %v831_v12 }
 0x258   : > { %v834_v56 = vadd.f32 %v833_v13, %v832_v32 }
 0x25a   : > { %835 = vadd.xlane.f32.xlu1 %v834_v56 }
 0x2e7   : > { %v836_v58 = vpop.xlane.xlu1 %835 }
 0x2e8   : > { %v837_v59 = vrot.slane %v836_v58, 4 }
 0x2ea   : > { %v838_v60 = vadd.f32 %v837_v59, %v836_v58 }
 0x2ec   : > { %v839_v61 = vrot.slane %v838_v60, 2 }
 0x2ee   : > { %v840_v62 = vadd.f32 %v839_v61, %v838_v60 }
 0x2f0   : > { %v841_v0 = vrot.slane %v840_v62, 1 }
 0x2f2   : > { %v842_v57 = vadd.f32 %v841_v0, %v840_v62 }
 0x2f4   : > { %994 = vpush %v842_v57 }
 0x325   : > { %s995_s6 = spop %994 }
 0x326   : > { %v844_v11 = vstv %s995_s6 }
 0x327   : > { %845 = vst [vmem:[%s153_s3] sm:$0xff] %v844_v11 }
 0x328   : > { %1094 = shalt.err (!%p1091_p3)
}
 0x329   : > { %s1095_s23 = scalar_lea.hbm %s1508_s14, 128  ;;  %s1099_s26 = scalar_lea.hbm %s1550_s2, 512 }
 0x32a   : > { %p1096_p4 = scmp.ne.s32.totalorder %s1508_s14, %s1095_s23  ;;  %p1100_p9 = scmp.lt.u32.totalorder %s1508_s14, %s1550_s2 }
 0x32b   : > { %p1101_p10 = scmp.lt.u32.totalorder %s1099_s26, %s1095_s23  ;;  %p1103_p12 = scmp.lt.u32.totalorder %s1095_s23, %s1508_s14 }
 0x32c   : > { %p1097_p7 = pnand %p1096_p4, %p1207_p5 }
 0x32d   : > { %p1102_p11 = por %p1101_p10, %p1100_p9 }
 0x32e   : > { %p1098_p8 = pneg %p1097_p7 }
 0x32f   : > { %p1104_p13 = por %p1103_p12, %p1102_p11 }
 0x331   : > { %p1105_p0 = pnand %p1104_p13, %p1098_p8 }
 0x333   : > { %1108 = shalt.err (!%p1105_p0)
}
 0x334   : > { %996 = dma.vmem_to_hbm [thread:$0]  (%p1207_p5), %s1503_s4, 128, %s1508_s14, %s847_s16  }
 0x335 PF: > { %p1002_p1 = scmp.ge.s32.totalorder %s1143_s12, 2  ;;  %s872_s29 = sand.u32 1, %s1131_s9  }
 0x336   : > { %s873_s30 = scalar_lea.sflag [#allocation3], %s872_s29 }
 0x337   : > { %p999_p2 = pnand %p1002_p1, %p1211_p6 }
 0x339   : > { %1126 = dma.done.wait (!%p999_p2), %s873_s30, 128  }
 0x33a   : > { %1128 = vsyncadd (!%p999_p2), %s873_s30, 4294967168  ;;  %p12_p3 = scmp.ge.s32.totalorder %s1194_s15, 6   ;;  %s1557_s9 = smov %s1135_s10 }
 0x33b   : > { %s1558_s10 = smov %s1139_s11  ;;  %s1559_s11 = smov %s1205_s18 }
 0x33c   : > { %s1560_s12 = smov %s1194_s15  ;;  %14 = sbr.rel (!%p12_p3) target bundleno = 3 (0x3), region = 66 }
 0x343   :  { %878 = vsyncpa [#allocation3], 1 }
 0x344   :  { %880 = vsyncpa [#allocation3 + $0x1], 1 }

</bundles_post_ra>
